<compile_context>
chip_gen: v5e
topology: v5e:2x2
jax: 0.10.0
libtpu: 0.0.40
codegen_flags: <defaults>
</compile_context>

<pallas_src>
import jax
import jax.numpy as jnp
from jax.experimental import pallas as pl
from jax.experimental.pallas import tpu as pltpu

# ---- module hyper-params (params dict of the PyTorch module) ------------------
N_INPUTS = 32          # n_inputs
HIDDEN = 128           # params['hidden_neurons']
N_LAYERS = 2           # params['n_layers']  -> total hidden blocks = N_LAYERS + 1
BATCH = 8
BN_EPS = 1e-5          # nn.BatchNorm1d default eps
BATCH_TILE = 128       # batch tile for the large-batch (grid) path
# act_func = ReLU, batch_norm enabled, dropout_prob irrelevant in eval mode.


def _bf16_elementwise_ok():
    """bf16 VPU elementwise exists on v6e/v7x; keep f32 elementwise on v5e and older."""
    try:
        kind = jax.devices()[0].device_kind.lower()
    except Exception:
        return False
    return ("v6" in kind) or ("v7" in kind)


def make_kernel(n_layers: int, use_bf16_act: bool):
    """Whole-network forward for one batch tile (works for any tile height).

    Refs:
      x_ref    : (TB, N_INPUTS)              f32  -- no padding, K=32 for layer 0
      w0_ref   : (N_INPUTS, HIDDEN)          bf16 -- BN-folded layer-0 weight
      b0_ref   : (1, HIDDEN)                 f32
      w_ref    : (n_layers, HIDDEN, HIDDEN)  bf16 -- BN-folded hidden weights
      b_ref    : (n_layers, 1, HIDDEN)       f32
      wout_ref : (1, HIDDEN)                 bf16 -- output-head weight as a lane row
      bout_ref : (1, 1)                      f32
      o_ref    : (TB, HIDDEN)                f32  -- lane-dense slab (result in every lane)
    """
    def kernel(x_ref, w0_ref, b0_ref, w_ref, b_ref, wout_ref, bout_ref, o_ref):
        # Layer 0: Linear(+folded BN), bf16 operands, f32 MXU accumulate, K = N_INPUTS.
        z = jnp.dot(x_ref[...].astype(jnp.bfloat16), w0_ref[...],
                    preferred_element_type=jnp.float32) + b0_ref[...]
        h = jnp.maximum(z, 0.0)                       # ReLU; Dropout = identity (eval)
        if use_bf16_act:
            h = h.astype(jnp.bfloat16)                # v6e/v7x: bf16 activations
        # Hidden blocks (static unroll).
        for l in range(n_layers):
            hin = h if use_bf16_act else h.astype(jnp.bfloat16)
            z = jnp.dot(hin, w_ref[l], preferred_element_type=jnp.float32) + b_ref[l]
            h = jnp.maximum(z, 0.0)
            if use_bf16_act:
                h = h.astype(jnp.bfloat16)
        # Output head Linear(H, 1) on VPU/XLU: broadcast-mul + cross-lane reduce.
        w_row = wout_ref[...].astype(jnp.float32)                    # (1, H)
        o = (jnp.sum(h.astype(jnp.float32) * w_row, axis=-1, keepdims=True)
             + bout_ref[...])                                        # (TB, 1)
        # Lane-dense store (unmasked vst); wrapper slices column 0.
        o_ref[...] = jnp.broadcast_to(o, o_ref.shape)
    return kernel


def make_forward(use_bf16_act: bool):
    kernel = make_kernel(N_LAYERS, use_bf16_act)

    @jax.jit
    def forward(x, w0, b0, w_stack, b_stack, w_out_row, b_out):
        B, n_in = x.shape
        flops = (2 * B * n_in * HIDDEN + 2 * B * HIDDEN * HIDDEN * N_LAYERS
                 + 2 * B * HIDDEN)
        bytes_accessed = (x.size * 4 + w0.size * 2 + b0.size * 4 + w_stack.size * 2
                          + b_stack.size * 4 + w_out_row.size * 2 + b_out.size * 4
                          + B * HIDDEN * 4)
        ce = pl.CostEstimate(flops=flops, transcendentals=0,
                             bytes_accessed=bytes_accessed)
        out_shape = jax.ShapeDtypeStruct((B, HIDDEN), jnp.float32)

        if B > BATCH_TILE and B % BATCH_TILE == 0:
            # Large batch: grid over batch tiles; weights keep a constant block index
            # so they are DMA'd once and stay VMEM-resident.  "parallel" lets the two
            # v7x TensorCores each take half the tiles.
            out = pl.pallas_call(
                kernel,
                out_shape=out_shape,
                grid=(B // BATCH_TILE,),
                in_specs=[
                    pl.BlockSpec((BATCH_TILE, n_in), lambda i: (i, 0)),
                    pl.BlockSpec((n_in, HIDDEN), lambda i: (0, 0)),
                    pl.BlockSpec((1, HIDDEN), lambda i: (0, 0)),
                    pl.BlockSpec((N_LAYERS, HIDDEN, HIDDEN), lambda i: (0, 0, 0)),
                    pl.BlockSpec((N_LAYERS, 1, HIDDEN), lambda i: (0, 0, 0)),
                    pl.BlockSpec((1, HIDDEN), lambda i: (0, 0)),
                    pl.BlockSpec((1, 1), lambda i: (0, 0)),
                ],
                out_specs=pl.BlockSpec((BATCH_TILE, HIDDEN), lambda i: (i, 0)),
                compiler_params=pltpu.CompilerParams(
                    dimension_semantics=("parallel",)),
                cost_estimate=ce,
            )(x, w0, b0, w_stack, b_stack, w_out_row, b_out)
        else:
            # Small batch: grid-less, everything VMEM-resident in one invocation
            # (~100 KiB of state; no pipelining overhead).
            out = pl.pallas_call(
                kernel,
                out_shape=out_shape,
                in_specs=[pl.BlockSpec(memory_space=pltpu.MemorySpace.VMEM)] * 7,
                out_specs=pl.BlockSpec(memory_space=pltpu.MemorySpace.VMEM),
                cost_estimate=ce,
            )(x, w0, b0, w_stack, b_stack, w_out_row, b_out)

        # Matches `X.squeeze()` of the PyTorch forward for BATCH > 1.
        # TODO(synk): for BATCH == 1, PyTorch .squeeze() returns a 0-d tensor; this returns (1,).
        return out[:, 0]

    return forward


def build_params(key):
    """Deterministic parameter init matching the module's __init__ shapes.

    Returns (kernel_params, raw_params):
      kernel_params = (w0 bf16 (32,H), b0 f32 (1,H),
                       w_stack bf16 (N_LAYERS,H,H), b_stack f32 (N_LAYERS,1,H),
                       w_out_row bf16 (1,H), b_out f32 (1,1))   -- BN-folded / packed
      raw_params    = original (unfolded) f32 params for the PyTorch-equivalent reference.
    """
    raw_layers, folded_w, folded_b = [], [], []
    sizes = [(N_INPUTS, HIDDEN)] + [(HIDDEN, HIDDEN)] * N_LAYERS
    for fan_in, fan_out in sizes:
        key, kw, kb, kg, kbt, krm, krv = jax.random.split(key, 7)
        w = jax.random.normal(kw, (fan_in, fan_out), jnp.float32) * 0.05
        b = jax.random.normal(kb, (1, fan_out), jnp.float32) * 0.05
        # BatchNorm1d params + running stats (eval mode)
        gamma = 1.0 + 0.1 * jax.random.normal(kg, (1, fan_out), jnp.float32)
        beta = 0.1 * jax.random.normal(kbt, (1, fan_out), jnp.float32)
        run_mean = 0.1 * jax.random.normal(krm, (1, fan_out), jnp.float32)
        run_var = 0.5 + jax.random.uniform(krv, (1, fan_out), jnp.float32)
        bn_scale = gamma / jnp.sqrt(run_var + BN_EPS)
        bn_shift = beta - run_mean * bn_scale
        raw_layers.append((w, b, bn_scale, bn_shift))
        # Fold BN into the Linear layer: (h@W + b)*s + t == h@(W*s) + (b*s + t)
        folded_w.append(w * bn_scale)
        folded_b.append(b * bn_scale + bn_shift)
    key, kw, kb = jax.random.split(key, 3)
    w_out = jax.random.normal(kw, (HIDDEN, 1), jnp.float32) * 0.05
    b_out = jax.random.normal(kb, (1, 1), jnp.float32) * 0.05

    w0 = folded_w[0].astype(jnp.bfloat16)                     # (N_INPUTS, H) -- no K padding
    b0 = folded_b[0]                                          # (1, H) f32
    w_stack = jnp.stack(folded_w[1:]).astype(jnp.bfloat16)    # (N_LAYERS, H, H) bf16
    b_stack = jnp.stack(folded_b[1:])                         # (N_LAYERS, 1, H) f32
    w_out_row = w_out.reshape(1, HIDDEN).astype(jnp.bfloat16)  # (1, H) bf16
    kernel_params = (w0, b0, w_stack, b_stack, w_out_row, b_out)
    raw_params = {"layers": raw_layers, "w_out": w_out, "b_out": b_out}
    return kernel_params, raw_params


def reference_forward_f32(x, raw):
    """Pure-f32 reference of the original PyTorch module (eval mode)."""
    h = x
    for (w, b, s, t) in raw["layers"]:
        h = jnp.maximum((h @ w + b) * s + t, 0.0)
    return jnp.squeeze(h @ raw["w_out"] + raw["b_out"])


def reference_forward_kernel_math(x, w0, b0, w_stack, b_stack, w_out_row, b_out,
                                  use_bf16_act):
    """Pure-JAX reference of the exact math the kernel performs."""
    h = jnp.dot(x.astype(jnp.bfloat16), w0, preferred_element_type=jnp.float32) + b0
    h = jnp.maximum(h, 0.0)
    if use_bf16_act:
        h = h.astype(jnp.bfloat16)
    for l in range(N_LAYERS):
        hin = h if use_bf16_act else h.astype(jnp.bfloat16)
        h = jnp.maximum(jnp.dot(hin, w_stack[l],
                                preferred_element_type=jnp.float32) + b_stack[l], 0.0)
        if use_bf16_act:
            h = h.astype(jnp.bfloat16)
    return (jnp.sum(h.astype(jnp.float32) * w_out_row.astype(jnp.float32), axis=-1)
            + b_out[0, 0])


if __name__ == "__main__":
    key = jax.random.PRNGKey(0)
    key, kx, kxb = jax.random.split(key, 3)
    x = jax.random.normal(kx, (BATCH, N_INPUTS), jnp.float32)
    kernel_params, raw_params = build_params(key)

    use_bf16_act = _bf16_elementwise_ok()   # bf16 ReLU/activations on v6e/v7x, f32 on v5e
    forward = make_forward(use_bf16_act)

    # --- small-batch (grid-less) path ---
    out = jax.block_until_ready(forward(x, *kernel_params))
    assert out.shape == (BATCH,), out.shape

    # Exact-math check (same bf16-folded computation, done in plain JAX).
    ref_exact = reference_forward_kernel_math(x, *kernel_params,
                                              use_bf16_act=use_bf16_act)
    assert jnp.allclose(out, ref_exact, atol=2e-4, rtol=2e-4), (out, ref_exact)

    # Fidelity check against the original f32 module semantics (bf16 weight cast
    # and BN folding shift results by ~1e-3 absolute at these magnitudes).
    ref_f32 = reference_forward_f32(x, raw_params)
    assert jnp.allclose(out, ref_f32, atol=1e-2), (out, ref_f32)

    # --- large-batch (grid over batch tiles, "parallel") path ---
    xb = jax.random.normal(kxb, (2 * BATCH_TILE, N_INPUTS), jnp.float32)
    outb = jax.block_until_ready(forward(xb, *kernel_params))
    assert outb.shape == (2 * BATCH_TILE,), outb.shape
    refb = reference_forward_kernel_math(xb, *kernel_params,
                                         use_bf16_act=use_bf16_act)
    assert jnp.allclose(outb, refb, atol=2e-4, rtol=2e-4), (outb, refb)

    print("KERNEL_OK")
</pallas_src>

<mosaic_0001>
module attributes {stable_mosaic.version = 11 : i64} {
  func.func @kernel(%arg0: memref<8x32xf32, #tpu.memory_space<vmem>>, %arg1: memref<32x128xbf16, #tpu.memory_space<vmem>>, %arg2: memref<1x128xf32, #tpu.memory_space<vmem>>, %arg3: memref<2x128x128xbf16, #tpu.memory_space<vmem>>, %arg4: memref<2x1x128xf32, #tpu.memory_space<vmem>>, %arg5: memref<1x128xbf16, #tpu.memory_space<vmem>>, %arg6: memref<1x1xf32, #tpu.memory_space<vmem>>, %arg7: memref<8x128xf32, #tpu.memory_space<vmem>>) attributes {dimension_semantics = [], scalar_prefetch = 0 : i64, scratch_operands = 0 : i64, tpu.core_type = #tpu.core_type<tc>} {
    %c0 = arith.constant 0 : index
    %c0_0 = arith.constant 0 : index
    %0 = vector.load %arg0[%c0, %c0_0] : memref<8x32xf32, #tpu.memory_space<vmem>>, vector<8x32xf32>
    %1 = arith.truncf %0 : vector<8x32xf32> to vector<8x32xbf16>
    %c0_1 = arith.constant 0 : index
    %c0_2 = arith.constant 0 : index
    %2 = vector.load %arg1[%c0_1, %c0_2] : memref<32x128xbf16, #tpu.memory_space<vmem>>, vector<32x128xbf16>
    %cst = arith.constant dense<0.000000e+00> : vector<8x128xf32>
    %3 = tpu.matmul %1, %2, %cst {dimension_numbers = #tpu.dot_dimension_numbers<[1], [0], [0], [1], [0, 0, 1, 1], [], []>} : vector<8x32xbf16>, vector<32x128xbf16>, vector<8x128xf32> -> vector<8x128xf32>
    %c0_3 = arith.constant 0 : index
    %c0_4 = arith.constant 0 : index
    %4 = vector.load %arg2[%c0_3, %c0_4] : memref<1x128xf32, #tpu.memory_space<vmem>>, vector<1x128xf32>
    %5 = vector.broadcast %4 : vector<1x128xf32> to vector<8x128xf32>
    %6 = arith.addf %3, %5 : vector<8x128xf32>
    %cst_5 = arith.constant 0.000000e+00 : f32
    %7 = vector.broadcast %cst_5 : f32 to vector<8x128xf32>
    %8 = arith.maximumf %6, %7 : vector<8x128xf32>
    %9 = arith.truncf %8 : vector<8x128xf32> to vector<8x128xbf16>
    %c0_6 = arith.constant 0 : index
    %c0_7 = arith.constant 0 : index
    %c0_8 = arith.constant 0 : index
    %10 = vector.load %arg3[%c0_6, %c0_7, %c0_8] : memref<2x128x128xbf16, #tpu.memory_space<vmem>>, vector<1x128x128xbf16>
    %11 = vector.shape_cast %10 : vector<1x128x128xbf16> to vector<128x128xbf16>
    %cst_9 = arith.constant dense<0.000000e+00> : vector<8x128xf32>
    %12 = tpu.matmul %9, %11, %cst_9 {dimension_numbers = #tpu.dot_dimension_numbers<[1], [0], [0], [1], [0, 0, 1, 1], [], []>} : vector<8x128xbf16>, vector<128x128xbf16>, vector<8x128xf32> -> vector<8x128xf32>
    %c0_10 = arith.constant 0 : index
    %c0_11 = arith.constant 0 : index
    %c0_12 = arith.constant 0 : index
    %13 = vector.load %arg4[%c0_10, %c0_11, %c0_12] : memref<2x1x128xf32, #tpu.memory_space<vmem>>, vector<1x1x128xf32>
    %14 = vector.shape_cast %13 : vector<1x1x128xf32> to vector<1x128xf32>
    %15 = vector.broadcast %14 : vector<1x128xf32> to vector<8x128xf32>
    %16 = arith.addf %12, %15 : vector<8x128xf32>
    %cst_13 = arith.constant 0.000000e+00 : f32
    %17 = vector.broadcast %cst_13 : f32 to vector<8x128xf32>
    %18 = arith.maximumf %16, %17 : vector<8x128xf32>
    %19 = arith.truncf %18 : vector<8x128xf32> to vector<8x128xbf16>
    %c1 = arith.constant 1 : index
    %c0_14 = arith.constant 0 : index
    %c0_15 = arith.constant 0 : index
    %20 = vector.load %arg3[%c1, %c0_14, %c0_15] : memref<2x128x128xbf16, #tpu.memory_space<vmem>>, vector<1x128x128xbf16>
    %21 = vector.shape_cast %20 : vector<1x128x128xbf16> to vector<128x128xbf16>
    %cst_16 = arith.constant dense<0.000000e+00> : vector<8x128xf32>
    %22 = tpu.matmul %19, %21, %cst_16 {dimension_numbers = #tpu.dot_dimension_numbers<[1], [0], [0], [1], [0, 0, 1, 1], [], []>} : vector<8x128xbf16>, vector<128x128xbf16>, vector<8x128xf32> -> vector<8x128xf32>
    %c1_17 = arith.constant 1 : index
    %c0_18 = arith.constant 0 : index
    %c0_19 = arith.constant 0 : index
    %23 = vector.load %arg4[%c1_17, %c0_18, %c0_19] : memref<2x1x128xf32, #tpu.memory_space<vmem>>, vector<1x1x128xf32>
    %24 = vector.shape_cast %23 : vector<1x1x128xf32> to vector<1x128xf32>
    %25 = vector.broadcast %24 : vector<1x128xf32> to vector<8x128xf32>
    %26 = arith.addf %22, %25 : vector<8x128xf32>
    %cst_20 = arith.constant 0.000000e+00 : f32
    %27 = vector.broadcast %cst_20 : f32 to vector<8x128xf32>
    %28 = arith.maximumf %26, %27 : vector<8x128xf32>
    %c0_21 = arith.constant 0 : index
    %c0_22 = arith.constant 0 : index
    %29 = vector.load %arg5[%c0_21, %c0_22] : memref<1x128xbf16, #tpu.memory_space<vmem>>, vector<1x128xbf16>
    %30 = arith.extf %29 : vector<1x128xbf16> to vector<1x128xf32>
    %31 = vector.broadcast %30 : vector<1x128xf32> to vector<8x128xf32>
    %32 = arith.mulf %28, %31 : vector<8x128xf32>
    %cst_23 = arith.constant dense<0.000000e+00> : vector<8xf32>
    %33 = vector.multi_reduction <add>, %32, %cst_23 [1] : vector<8x128xf32> to vector<8xf32>
    %34 = vector.shape_cast %33 : vector<8xf32> to vector<8x1xf32>
    %c0_24 = arith.constant 0 : index
    %c0_25 = arith.constant 0 : index
    %35 = vector.load %arg6[%c0_24, %c0_25] : memref<1x1xf32, #tpu.memory_space<vmem>>, vector<1x1xf32>
    %36 = vector.broadcast %35 : vector<1x1xf32> to vector<8x1xf32>
    %37 = arith.addf %34, %36 : vector<8x1xf32>
    %38 = vector.shape_cast %37 : vector<8x1xf32> to vector<8x1xf32>
    %39 = vector.broadcast %38 : vector<8x1xf32> to vector<8x128xf32>
    %c0_26 = arith.constant 0 : index
    %c0_27 = arith.constant 0 : index
    %40 = vector.load %arg7[%c0_26, %c0_27] : memref<8x128xf32, #tpu.memory_space<vmem>>, vector<8x128xf32>
    tpu.vector_store %arg7[%c0_26, %c0_27], %39 {strides = array<i32>} : memref<8x128xf32, #tpu.memory_space<vmem>>, vector<8x128xf32>,
    return
  }
}

</mosaic_0001>

<bundles_post_ra>
// kernel: forward.1
= control target key start
LH: loop header
LB: loop body
LE: loop exit
PB: predicated region body
PF: predicated region fallthrough
CT: control target
= control target key end

     0   :  { %s557_s0 = inlined_call_operand.hbm [shape: f32[8,32], index: 0, kind: input, shape index: {}]   ;;  %s558_s1 = inlined_call_operand.hbm [shape: bf16[32,128], index: 1, kind: input, shape index: {}]   ;;  %s559_s2 = inlined_call_operand.vmem [shape: f32[1,128], index: 2, kind: input, shape index: {}]   ;;  %s560_s3 = inlined_call_operand.hbm [shape: bf16[2,128,128], index: 3, kind: input, shape index: {}]   ;;  %s561_s4 = inlined_call_operand.vmem [shape: f32[2,1,128], index: 4, kind: input, shape index: {}]   ;;  %s562_s5 = inlined_call_operand.vmem [shape: bf16[1,128], index: 5, kind: input, shape index: {}]   ;;  %s563_s6 = inlined_call_operand.<no memory space> [shape: f32[1,1], index: 6, kind: input, shape index: {}]   ;;  %s564_s7 = inlined_call_operand.vmem [shape: f32[8,128], index: 7, kind: output, shape index: {}]  }
   0x1   :  { %v12_v0 = vstv %s563_s6 }
   0x2   :  { %13 = vst [vmem:[#allocation2] sm:$0x1] %v12_v0 }
   0x3   :  { %14 = vsyncpa [#allocation4], 0 }
   0x4   :  { %15 = vsyncpa [#allocation6], 0  ;;  %s31_s28 = sshll.u32 %s558_s1, 4  ;;  %s484_s29 = smov [#allocation5]   ;;  %s32_s28 = int_to_ptr.hbm [resolvable:$true] %s31_s28 }
   0x5   :  { %s33_s30 = sshll.u32 %s484_s29, 4  ;;  %s21_s10 = sshll.u32 %s557_s0, 4  ;;  %s34_s30 = int_to_ptr.vmem [resolvable:$true] %s33_s30  ;;  %s22_s10 = int_to_ptr.hbm [resolvable:$true] %s21_s10 }
   0x6   :  { %s485_s11 = smov 64   ;;  %s486_s12 = smov 4  }
   0x7   :  { %39 = dma.hbm_to_vmem [thread:$0]  %s32_s28, 256, %s34_s30, [#allocation6], %s485_s11, %s485_s11, %s486_s12  }
   0x8   :  { %s487_s6 = smov [#allocation3]   ;;  %s46_s16 = sshll.u32 %s560_s3, 4  ;;  %s47_s16 = int_to_ptr.hbm [resolvable:$true] %s46_s16 }
   0x9   :  { %s23_s13 = sshll.u32 %s487_s6, 4  ;;  %s488_s1 = smov [#allocation7]   ;;  %s24_s13 = int_to_ptr.vmem [resolvable:$true] %s23_s13 }
   0xa   :  { %26 = dma.hbm_to_vmem [thread:$0]  %s22_s10, 128, %s24_s13, [#allocation4]  }
   0xb   :  { %s48_s17 = sshll.u32 %s488_s1, 4  ;;  %s49_s17 = int_to_ptr.vmem [resolvable:$true] %s48_s17 }
   0xc   :  { %54 = dma.hbm_to_vmem [thread:$0]  %s47_s16, 2048, %s49_s17, [#allocation6], %s485_s11, %s485_s11, %s486_s12  }
   0xd   :  { %480 = dma.done.wait [#allocation4], 128  }
   0xe   :  { %481 = vsyncadd [#allocation4], 4294967168 }
   0xf   :  { %482 = dma.done.wait [#allocation6], 2304  }
  0x10   :  { %483 = vsyncadd [#allocation6], 4294964992  ;;  %v380_v1 = vld [vmem:[#allocation5 + $0x8] sm:$0xff]  ;;  %v379_v3 = vld [vmem:[#allocation5] sm:$0xff]  ;;  %vm96_vm0 = vcmask 261120   ;;  %v489_v42 = vmov 0  }
  0x11   :  { %v388_v2 = vld [vmem:[#allocation7 + $0x38] sm:$0xff]  ;;  %106 = vmatpush.bf16.msra.mxu0 %v380_v1  ;;  %v74_v4 = vld [vmem:[#allocation3] sm:$0xff]  ;;  %v387_v5 = vld [vmem:[#allocation7 + $0x30] sm:$0xff]  ;;  %403 = vset.pattern.permute.xlu0 %v489_v42 }
  0x12   :  { %183 = vmatpush.bf16.msra.mxu1 %v388_v2  ;;  %v75_v6 = vpack.c.bf16 %v74_v4, %v74_v4  ;;  %v386_v7 = vld [vmem:[#allocation7 + $0x28] sm:$0xff]  ;;  %v385_v8 = vld [vmem:[#allocation7 + $0x20] sm:$0xff]  ;;  %v384_v9 = vld [vmem:[#allocation7 + $0x18] sm:$0xff] }
  0x13   :  { %v383_v10 = vld [vmem:[#allocation7 + $0x10] sm:$0xff]  ;;  %v382_v11 = vld [vmem:[#allocation7 + $0x8] sm:$0xff]  ;;  %v381_v12 = vld [vmem:[#allocation7] sm:$0xff] }
  0x14   :  { %v396_v13 = vld [vmem:[#allocation7 + $0x78] sm:$0xff]  ;;  %v395_v14 = vld [vmem:[#allocation7 + $0x70] sm:$0xff]  ;;  %v394_v15 = vld [vmem:[#allocation7 + $0x68] sm:$0xff] }
  0x15   :  { %107 = vmatpush.bf16.msra.mxu0 %v379_v3  ;;  %268 = vmatpush.bf16.msra.mxu2 %v396_v13  ;;  %v393_v16 = vld [vmem:[#allocation7 + $0x60] sm:$0xff]  ;;  %v392_v17 = vld [vmem:[#allocation7 + $0x58] sm:$0xff]  ;;  %v391_v18 = vld [vmem:[#allocation7 + $0x50] sm:$0xff] }
  0x16   :  { %184 = vmatpush.bf16.msra.mxu1 %v387_v5  ;;  %v404_v19 = vld [vmem:[%s559_s2] ss:$0 sm:$0xff]  ;;  %v390_v25 = vld [vmem:[#allocation7 + $0x48] sm:$0xff] }
  0x17   :  { %v389_v26 = vld [vmem:[#allocation7 + $0x40] sm:$0xff]  ;;  %v406_v34 = vld [vmem:[%s561_s4 + $0x1] ss:$0 sm:$0xff] }
  0x18   :  { %313 = vmatmul.msk.bf16.vlgmr.msra.gmra.mxu0 %vm96_vm0, %v75_v6  ;;  %v405_v27 = vld [vmem:[%s561_s4] ss:$0 sm:$0xff] }
  0x19   :  { %269 = vmatpush.bf16.msra.mxu2 %v395_v14  ;;  %v282_v33 = vld [vmem:[%s562_s5] sm:$0x1] }
  0x1a   :  { %185 = vmatpush.bf16.msra.mxu1 %v386_v7  ;;  %v283_v35 = vunpack.c.l.bf16 %v282_v33  ;;  %v407_v43 = vld [vmem:[#allocation2] ss:$0 sm:$0xff] }
  0x1c   :  { %v284_v38 = vperm.slane %v283_v35, 0 }
  0x1d   :  { %270 = vmatpush.bf16.msra.mxu2 %v394_v15 }
  0x1e   :  { %186 = vmatpush.bf16.msra.mxu1 %v385_v8 }
  0x21   :  { %271 = vmatpush.bf16.msra.mxu2 %v393_v16 }
  0x22   :  { %187 = vmatpush.bf16.msra.mxu1 %v384_v9 }
  0x25   :  { %272 = vmatpush.bf16.msra.mxu2 %v392_v17 }
  0x26   :  { %188 = vmatpush.bf16.msra.mxu1 %v383_v10 }
  0x29   :  { %273 = vmatpush.bf16.msra.mxu2 %v391_v18 }
  0x2a   :  { %189 = vmatpush.bf16.msra.mxu1 %v382_v11 }
  0x2d   :  { %274 = vmatpush.bf16.msra.mxu2 %v390_v25 }
  0x2e   :  { %190 = vmatpush.bf16.msra.mxu1 %v381_v12 }
  0x31   :  { %275 = vmatpush.bf16.msra.mxu2 %v389_v26 }
  0x95   :  { %v109_v20 = vpop.f32.mrf.mxu0 }
  0x96   :  { %v110_v21 = vadd.f32 %v404_v19, %v109_v20 }
  0x98   :  { %v113_v22 = vmax.f32 %v110_v21, 0.0 }
  0x9a   :  { %v114_v23 = vpack.c.bf16 %v113_v22, %v113_v22 }
  0x9c   :  { %191 = vmatmul.bf16.vlgmr.msra.gmra.mxu1 %v114_v23 }
  0x9d   :  { %v111_v24 = vpop.f32.mrf.mxu0 }
 0x119   :  { %v192_v28 = vpop.f32.mrf.mxu1 }
 0x11a   :  { %v193_v29 = vadd.f32 %v405_v27, %v192_v28 }
 0x11c   :  { %v196_v30 = vmax.f32 %v193_v29, 0.0 }
 0x11e   :  { %v197_v31 = vpack.c.bf16 %v196_v30, %v196_v30 }
 0x120   :  { %276 = vmatmul.bf16.vlgmr.msra.gmra.mxu2 %v197_v31 }
 0x121   :  { %v194_v32 = vpop.f32.mrf.mxu1 }
 0x1a3   :  { %v277_v36 = vpop.f32.mrf.mxu2 }
 0x1a4   :  { %v278_v37 = vadd.f32 %v406_v34, %v277_v36 }
 0x1a6   :  { %v281_v39 = vmax.f32 %v278_v37, 0.0 }
 0x1a8   :  { %v285_v40 = vmul.f32 %v284_v38, %v281_v39 }
 0x1aa   :  { %286 = vadd.xlane.f32.xlu0 %v285_v40 }
 0x1ab   :  { %v279_v41 = vpop.f32.mrf.mxu2 }
 0x21d   :  { %v287_v44 = vpop.xlane.xlu0 %286 }
 0x21e   :  { %v292_v45 = vadd.f32 %v407_v43, %v287_v44 }
 0x220   :  { %295 = vperm.xlu0 %403, %v292_v45  }
 0x292   :  { %v296_v46 = vpop.permute.xlu0 %295 }
 0x293   :  { %298 = vst [vmem:[%s564_s7] sm:$0xff] %v296_v46 }
 0x294   :  { %303 = vsyncpa [#allocation4], 1 }
 0x295   :  { %304 = vsyncpa [#allocation6], 1 }

</bundles_post_ra>
